<compile_context>
chip_gen: v7x
topology: tpu7x:2x2x1
jax: 0.10.0
libtpu: 0.0.40
codegen_flags: <defaults>
</compile_context>

<pallas_src>
import functools
import math

import jax
import jax.numpy as jnp
from jax.experimental import pallas as pl
from jax.experimental.pallas import tpu as pltpu

_NEG_BIG = -1e30                 # softmax mask for padded class lanes (must stay f32)
_DEFAULT_TM = 256                # adjacency row tile
_DEFAULT_TK = 1024               # adjacency contraction (column) tile when K-tiling
_SINGLE_K_MAX = 2048             # up to this many padded columns: one full-width K step
_SUPPORT_BUDGET = 32 * 1024 * 1024   # VMEM budget (double-buffered) for the X@W pre-pass slab


def _round_up(x, m):
    return (x + m - 1) // m * m


def _default_vmem_limit():
    """Generation-aware scoped-VMEM limit: ~100 MiB on v5e/v6e, ~56 MiB on v7x."""
    cap = 64 * 1024 * 1024
    try:
        get_info = getattr(pltpu, "get_tpu_info", None)
        if get_info is not None:
            cap_attr = getattr(get_info(), "vmem_capacity_bytes", None)
            if cap_attr:
                cap = int(cap_attr)
    except Exception:
        pass
    return max(32 * 1024 * 1024, min(100 * 1024 * 1024, cap - 8 * 1024 * 1024))


_VMEM_LIMIT = _default_vmem_limit()


# ----------------------------- tiling plan -----------------------------

def _plan(n, tile_rows, k_tile, single_k_max):
    """Padded adjacency shape + tiles: (n_rows, n_cols, tm, tk)."""
    if tile_rows % 8 or k_tile % 128:
        raise ValueError("tile_rows must be a multiple of 8 and k_tile a multiple of 128")
    n8 = _round_up(n, 8)
    if n8 <= single_k_max:
        # Small/medium graph: single full-width contraction step, minimal padding.
        tm = min(tile_rows, n8)
        n_rows = _round_up(n, tm)
        n_cols = n8
        tk = n_cols
    else:
        # Large graph: K-tile the contraction; square padding keeps the layer-1
        # output directly reusable as the layer-2 support.
        step = max(k_tile, tile_rows)
        if step % tile_rows or step % k_tile:
            raise ValueError("tile_rows and k_tile must divide each other's max")
        tm, tk = tile_rows, k_tile
        n_rows = n_cols = _round_up(n, step)
    return n_rows, n_cols, tm, tk


def _support_row_tile(n_cols, f_p, itemsize, quantum):
    """Row tile for the X @ W pre-pass: as large as the VMEM budget allows."""
    if 2 * n_cols * f_p * itemsize <= _SUPPORT_BUDGET:
        return n_cols                       # whole slab in one grid step
    t = quantum
    while (t // 2) >= 8 and (t // 2) % 8 == 0 and n_cols % (t // 2) == 0 \
            and 2 * t * f_p * itemsize > _SUPPORT_BUDGET:
        t //= 2
    # TODO(synk): feature dims so large that one `quantum`-row slab still exceeds
    #             the budget would need K-tiling of the feature axis as well.
    return t


def prepare_adj(adj, *, operand_dtype=jnp.bfloat16, tile_rows=_DEFAULT_TM,
                k_tile=_DEFAULT_TK, single_k_max=_SINGLE_K_MAX):
    """Pad + cast the dense adjacency ONCE, outside the jitted forward.

    Zero padding is exact (padded rows/cols contribute nothing); bf16 streaming
    is the default since the aggregation is HBM-bandwidth bound.
    """
    n = adj.shape[0]
    n_rows, n_cols, _, _ = _plan(n, tile_rows, k_tile, single_k_max)
    adj_p = jnp.zeros((n_rows, n_cols), jnp.float32).at[:n, :n].set(adj.astype(jnp.float32))
    return adj_p.astype(operand_dtype)


# ----------------------------- kernels -----------------------------

def _support_kernel(x_ref, w_ref, out_ref):
    # out_tile = X_tile @ W   (f32 accumulation on the MXU)
    out_ref[...] = jnp.dot(
        x_ref[...], w_ref[...], preferred_element_type=jnp.float32
    ).astype(out_ref.dtype)


def _layer1_fused_kernel(adj_ref, s1_ref, b1_ref, w2_ref, s2_ref, acc_ref):
    # acc += adj_tile @ support1_ktile ; on last K: s2 = ReLU(acc + b1) @ W2
    k = pl.program_id(1)

    @pl.when(k == 0)
    def _():
        acc_ref[...] = jnp.zeros_like(acc_ref)

    acc_ref[...] += jnp.dot(adj_ref[...], s1_ref[...],
                            preferred_element_type=jnp.float32)

    @pl.when(k == pl.num_programs(1) - 1)
    def _():
        h = jnp.maximum(acc_ref[...] + b1_ref[...], 0.0)          # f32 bias/activation
        s2_ref[...] = jnp.dot(h.astype(w2_ref.dtype), w2_ref[...],
                              preferred_element_type=jnp.float32).astype(s2_ref.dtype)


def _layer2_softmax_kernel(adj_ref, s2_ref, b2_ref, out_ref, acc_ref):
    # acc += adj_tile @ s2_ktile ; on last K: out = softmax(acc + b2)
    k = pl.program_id(1)

    @pl.when(k == 0)
    def _():
        acc_ref[...] = jnp.zeros_like(acc_ref)

    acc_ref[...] += jnp.dot(adj_ref[...], s2_ref[...],
                            preferred_element_type=jnp.float32)

    @pl.when(k == pl.num_programs(1) - 1)
    def _():
        logits = acc_ref[...] + b2_ref[...]                       # f32; padded lanes -1e30
        m = jnp.max(logits, axis=-1, keepdims=True)
        e = jnp.exp(logits - m)
        inv = pl.reciprocal(jnp.sum(e, axis=-1, keepdims=True), approx=True)
        out_ref[...] = (e * inv).astype(out_ref.dtype)


# ------------------------ pallas_call wrappers ------------------------

def _support_matmul(x_p, w_p, row_tile):
    """(Nc, Fp) @ (Fp, Hp) -> (Nc, Hp), row-tiled with a large slab."""
    n_rows, f_p = x_p.shape
    h_p = w_p.shape[1]
    itemsize = x_p.dtype.itemsize
    return pl.pallas_call(
        _support_kernel,
        out_shape=jax.ShapeDtypeStruct((n_rows, h_p), x_p.dtype),
        grid_spec=pltpu.PrefetchScalarGridSpec(
            num_scalar_prefetch=0,
            grid=(n_rows // row_tile,),
            in_specs=[
                pl.BlockSpec((row_tile, f_p), lambda i: (i, 0)),   # X row slab
                pl.BlockSpec((f_p, h_p), lambda i: (0, 0)),        # W (resident)
            ],
            out_specs=pl.BlockSpec((row_tile, h_p), lambda i: (i, 0)),
        ),
        compiler_params=pltpu.CompilerParams(
            dimension_semantics=("parallel",),
            vmem_limit_bytes=_VMEM_LIMIT,
        ),
        cost_estimate=pl.CostEstimate(
            flops=2 * n_rows * f_p * h_p,
            transcendentals=0,
            bytes_accessed=(n_rows * f_p + f_p * h_p + n_rows * h_p) * itemsize,
        ),
    )(x_p, w_p)


def _layer1_fused(adj_p, support1, b1, w2, tm, tk, out_dtype):
    """s2 = ReLU(adj @ support1 + b1) @ W2, K-tiled with an f32 accumulator."""
    n_rows, n_cols = adj_p.shape
    h_p = support1.shape[1]
    c_p = w2.shape[1]
    out_itemsize = jnp.dtype(out_dtype).itemsize
    return pl.pallas_call(
        _layer1_fused_kernel,
        out_shape=jax.ShapeDtypeStruct((n_rows, c_p), out_dtype),
        grid_spec=pltpu.PrefetchScalarGridSpec(
            num_scalar_prefetch=0,
            grid=(n_rows // tm, n_cols // tk),
            in_specs=[
                pl.BlockSpec((tm, tk), lambda i, k: (i, k)),       # adj tile (streamed)
                pl.BlockSpec((tk, h_p), lambda i, k: (k, 0)),      # support1 K-tile
                pl.BlockSpec((1, h_p), lambda i, k: (0, 0)),       # b1 (f32, resident)
                pl.BlockSpec((h_p, c_p), lambda i, k: (0, 0)),     # W2 (resident)
            ],
            out_specs=pl.BlockSpec((tm, c_p), lambda i, k: (i, 0)),
            scratch_shapes=[pltpu.VMEM((tm, h_p), jnp.float32)],   # f32 accumulator
        ),
        compiler_params=pltpu.CompilerParams(
            dimension_semantics=("parallel", "arbitrary"),
            vmem_limit_bytes=_VMEM_LIMIT,
        ),
        cost_estimate=pl.CostEstimate(
            flops=2 * n_rows * n_cols * h_p + 2 * n_rows * h_p * c_p,
            transcendentals=0,
            bytes_accessed=(adj_p.size * adj_p.dtype.itemsize
                            + support1.size * support1.dtype.itemsize
                            + w2.size * w2.dtype.itemsize
                            + b1.size * 4
                            + n_rows * c_p * out_itemsize),
        ),
    )(adj_p, support1, b1, w2)


def _layer2_softmax(adj_p, s2, b2, tm, tk):
    """out = softmax(adj @ s2 + b2), K-tiled with an f32 accumulator."""
    n_rows, n_cols = adj_p.shape
    c_p = s2.shape[1]
    return pl.pallas_call(
        _layer2_softmax_kernel,
        out_shape=jax.ShapeDtypeStruct((n_rows, c_p), jnp.float32),
        grid_spec=pltpu.PrefetchScalarGridSpec(
            num_scalar_prefetch=0,
            grid=(n_rows // tm, n_cols // tk),
            in_specs=[
                pl.BlockSpec((tm, tk), lambda i, k: (i, k)),       # adj tile (streamed)
                pl.BlockSpec((tk, c_p), lambda i, k: (k, 0)),      # s2 K-tile
                pl.BlockSpec((1, c_p), lambda i, k: (0, 0)),       # b2 (f32, resident)
            ],
            out_specs=pl.BlockSpec((tm, c_p), lambda i, k: (i, 0)),
            scratch_shapes=[pltpu.VMEM((tm, c_p), jnp.float32)],   # f32 accumulator
        ),
        compiler_params=pltpu.CompilerParams(
            dimension_semantics=("parallel", "arbitrary"),
            vmem_limit_bytes=_VMEM_LIMIT,
        ),
        cost_estimate=pl.CostEstimate(
            flops=2 * n_rows * n_cols * c_p,
            transcendentals=n_rows * c_p,
            bytes_accessed=(adj_p.size * adj_p.dtype.itemsize
                            + s2.size * s2.dtype.itemsize
                            + b2.size * 4
                            + n_rows * c_p * 4),
        ),
    )(adj_p, s2, b2)


# ----------------------------- forward -----------------------------

@functools.partial(jax.jit, static_argnames=("tile_rows", "k_tile", "single_k_max"))
def gcn_forward(x, adj_p, w1, b1, w2, b2, *, tile_rows=_DEFAULT_TM,
                k_tile=_DEFAULT_TK, single_k_max=_SINGLE_K_MAX):
    """GCN inference. `adj_p` must come from prepare_adj() with the same tiling args."""
    n, f = x.shape
    h_dim = w1.shape[1]
    c_dim = w2.shape[1]
    n_rows, n_cols, tm, tk = _plan(n, tile_rows, k_tile, single_k_max)
    if adj_p.shape != (n_rows, n_cols):
        raise ValueError(
            f"adj_p has shape {adj_p.shape}, expected {(n_rows, n_cols)}; "
            "build it with prepare_adj(adj, tile_rows=..., k_tile=..., single_k_max=...)")

    f32 = jnp.float32
    op_dtype = adj_p.dtype            # streamed matmul-operand dtype (bf16 default); acc is f32

    f_p = _round_up(f, 128)           # lane-dense feature dim
    h_p = _round_up(h_dim, 128)       # lane-dense hidden dim
    c_p = _round_up(c_dim, 128)       # lane-dense class dim (unmasked stores)

    # Small zero-padded operands (cheap; the N^2 adjacency padding is hoisted out).
    x_p = jnp.zeros((n_cols, f_p), f32).at[:n, :f].set(x.astype(f32)).astype(op_dtype)
    w1_p = jnp.zeros((f_p, h_p), f32).at[:f, :h_dim].set(w1.astype(f32)).astype(op_dtype)
    w2_p = jnp.zeros((h_p, c_p), f32).at[:h_dim, :c_dim].set(w2.astype(f32)).astype(op_dtype)
    b1_p = jnp.zeros((1, h_p), f32).at[0, :h_dim].set(b1.astype(f32))
    b2_p = jnp.full((1, c_p), _NEG_BIG, f32).at[0, :c_dim].set(b2.astype(f32))

    # ---- pre-pass: support1 = X @ W1 (rows aligned with the adj contraction dim) ----
    st = _support_row_tile(n_cols, f_p, jnp.dtype(op_dtype).itemsize, max(tk, tm))
    support1 = _support_matmul(x_p, w1_p, st)                        # (n_cols, h_p)

    # ---- layer 1 (+ fused h @ W2 epilogue): s2 = ReLU(adj @ support1 + b1) @ W2 ----
    s2 = _layer1_fused(adj_p, support1, b1_p, w2_p, tm, tk, op_dtype)  # (n_rows, c_p)

    # ---- layer 2 + softmax: out = softmax(adj @ s2 + b2) ----
    probs = _layer2_softmax(adj_p, s2, b2_p, tm, tk)                   # (n_rows, c_p) f32

    return probs[:n, :c_dim]


# ----------------------------- params / demo -----------------------------

def init_params(key, feature_dim, hidden_size, num_classes):
    k1, k2, k3, k4 = jax.random.split(key, 4)
    stdv1 = 1.0 / math.sqrt(hidden_size)
    stdv2 = 1.0 / math.sqrt(num_classes)
    w1 = jax.random.uniform(k1, (feature_dim, hidden_size), jnp.float32, -stdv1, stdv1)
    b1 = jax.random.uniform(k2, (hidden_size,), jnp.float32, -stdv1, stdv1)
    w2 = jax.random.uniform(k3, (hidden_size, num_classes), jnp.float32, -stdv2, stdv2)
    b2 = jax.random.uniform(k4, (num_classes,), jnp.float32, -stdv2, stdv2)
    return w1, b1, w2, b2


def _reference(x, adj, w1, b1, w2, b2):
    h = jnp.maximum(adj @ (x @ w1) + b1, 0.0)
    logits = adj @ (h @ w2) + b2
    return jax.nn.softmax(logits, axis=-1)


def _make_graph(key, n, p=0.2):
    # symmetric, row-normalized adjacency with self loops (dense)
    a_raw = (jax.random.uniform(key, (n, n)) < p).astype(jnp.float32)
    a_sym = jnp.clip(a_raw + a_raw.T + jnp.eye(n, dtype=jnp.float32), 0.0, 1.0)
    deg = jnp.sum(a_sym, axis=-1, keepdims=True)
    return a_sym / deg


if __name__ == "__main__":
    key = jax.random.PRNGKey(0)
    feature_dim, hidden_size, num_classes = 16, 16, 7

    # ---- small graph: single K step, single row tile ----
    num_nodes = 32
    kx, ka, kp, knext = jax.random.split(key, 4)
    x = jax.random.normal(kx, (num_nodes, feature_dim), jnp.float32)
    adj = _make_graph(ka, num_nodes, p=0.2)
    w1, b1, w2, b2 = init_params(kp, feature_dim, hidden_size, num_classes)
    ref = _reference(x, adj, w1, b1, w2, b2)

    # f32-operand path (tight tolerance)
    adj_p32 = prepare_adj(adj, operand_dtype=jnp.float32)
    out32 = jax.block_until_ready(gcn_forward(x, adj_p32, w1, b1, w2, b2))
    assert out32.shape == (num_nodes, num_classes)
    assert jnp.allclose(out32, ref, atol=5e-3, rtol=5e-3), "f32 path mismatch"

    # default path: bf16-streamed adjacency / operands, f32 accumulation
    adj_pbf = prepare_adj(adj)
    outbf = jax.block_until_ready(gcn_forward(x, adj_pbf, w1, b1, w2, b2))
    assert outbf.shape == (num_nodes, num_classes)
    assert jnp.allclose(outbf, ref, atol=3e-2, rtol=3e-2), "bf16 path mismatch"

    # ---- slightly larger graph forcing the K-tiled, multi-row-tile path ----
    n2 = 300
    kx2, ka2 = jax.random.split(knext)
    x2 = jax.random.normal(kx2, (n2, feature_dim), jnp.float32)
    adj2 = _make_graph(ka2, n2, p=0.05)
    ref2 = _reference(x2, adj2, w1, b1, w2, b2)
    tiling = dict(tile_rows=64, k_tile=128, single_k_max=128)   # small tiles to exercise the K axis
    adj2_p = prepare_adj(adj2, **tiling)
    out2 = jax.block_until_ready(gcn_forward(x2, adj2_p, w1, b1, w2, b2, **tiling))
    assert out2.shape == (n2, num_classes)
    assert jnp.allclose(out2, ref2, atol=3e-2, rtol=3e-2), "K-tiled path mismatch"

    print("KERNEL_OK")
</pallas_src>

<mosaic_0001>
module attributes {stable_mosaic.version = 11 : i64} {
  func.func @_support_kernel(%arg0: i32, %arg1: memref<32x128xf32, #tpu.memory_space<vmem>>, %arg2: memref<128x128xf32, #tpu.memory_space<vmem>>, %arg3: memref<32x128xf32, #tpu.memory_space<vmem>>) attributes {dimension_semantics = [#tpu.dimension_semantics<parallel>], iteration_bounds = array<i64: 1>, scalar_prefetch = 0 : i64, scratch_operands = 0 : i64, tpu.core_type = #tpu.core_type<tc>, window_params = [{transform_indices = @transform_0, window_bounds = array<i64: 32, 128>}, {pipeline_mode = #tpu.pipeline_mode<synchronous>, transform_indices = @transform_1, window_bounds = array<i64: 128, 128>}, {transform_indices = @transform_2, window_bounds = array<i64: 32, 128>}]} {
    %c0 = arith.constant 0 : index
    %c0_0 = arith.constant 0 : index
    %0 = vector.load %arg1[%c0, %c0_0] : memref<32x128xf32, #tpu.memory_space<vmem>>, vector<32x128xf32>
    %c0_1 = arith.constant 0 : index
    %c0_2 = arith.constant 0 : index
    %1 = vector.load %arg2[%c0_1, %c0_2] : memref<128x128xf32, #tpu.memory_space<vmem>>, vector<128x128xf32>
    %cst = arith.constant dense<0.000000e+00> : vector<32x128xf32>
    %2 = tpu.matmul %0, %1, %cst {dimension_numbers = #tpu.dot_dimension_numbers<[1], [0], [0], [1], [0, 0, 1, 1], [], []>} : vector<32x128xf32>, vector<128x128xf32>, vector<32x128xf32> -> vector<32x128xf32>
    %c0_3 = arith.constant 0 : index
    %c0_4 = arith.constant 0 : index
    %3 = vector.load %arg3[%c0_3, %c0_4] : memref<32x128xf32, #tpu.memory_space<vmem>>, vector<32x128xf32>
    tpu.vector_store %arg3[%c0_3, %c0_4], %2 {strides = array<i32>} : memref<32x128xf32, #tpu.memory_space<vmem>>, vector<32x128xf32>,
    return
  }
  func.func @transform_0(%arg0: i32) -> (i32, i32) {
    %c0_i32 = arith.constant 0 : i32
    %c0_i32_0 = arith.constant 0 : i32
    return %arg0, %c0_i32 : i32, i32
  }
  func.func @transform_1(%arg0: i32) -> (i32, i32) {
    %c0_i32 = arith.constant 0 : i32
    %c0_i32_0 = arith.constant 0 : i32
    %c0_i32_1 = arith.constant 0 : i32
    return %c0_i32, %c0_i32_0 : i32, i32
  }
  func.func @transform_2(%arg0: i32) -> (i32, i32) {
    %c0_i32 = arith.constant 0 : i32
    %c0_i32_0 = arith.constant 0 : i32
    return %arg0, %c0_i32 : i32, i32
  }
}

module attributes {stable_mosaic.version = 11 : i64} {
  func.func @_layer1_fused_kernel(%arg0: i32, %arg1: i32, %arg2: memref<32x32xf32, #tpu.memory_space<vmem>>, %arg3: memref<32x128xf32, #tpu.memory_space<vmem>>, %arg4: memref<1x128xf32, #tpu.memory_space<vmem>>, %arg5: memref<128x128xf32, #tpu.memory_space<vmem>>, %arg6: memref<32x128xf32, #tpu.memory_space<vmem>>, %arg7: memref<32x128xf32, #tpu.memory_space<vmem>>) attributes {dimension_semantics = [#tpu.dimension_semantics<parallel>, #tpu.dimension_semantics<arbitrary>], iteration_bounds = array<i64: 1, 1>, scalar_prefetch = 0 : i64, scratch_operands = 1 : i64, tpu.core_type = #tpu.core_type<tc>, window_params = [{transform_indices = @transform_0, window_bounds = array<i64: 32, 32>}, {transform_indices = @transform_1, window_bounds = array<i64: 32, 128>}, {pipeline_mode = #tpu.pipeline_mode<synchronous>, transform_indices = @transform_2, window_bounds = array<i64: 1, 128>}, {pipeline_mode = #tpu.pipeline_mode<synchronous>, transform_indices = @transform_3, window_bounds = array<i64: 128, 128>}, {transform_indices = @transform_4, window_bounds = array<i64: 32, 128>}]} {
    %c0_i32 = arith.constant 0 : i32
    %0 = arith.cmpi eq, %arg1, %c0_i32 : i32
    %1 = arith.extui %0 : i1 to i32
    %c0_i32_0 = arith.constant 0 : i32
    %2 = arith.cmpi ne, %1, %c0_i32_0 : i32
    scf.if %2 {
      %cst_10 = arith.constant 0.000000e+00 : f32
      %12 = vector.broadcast %cst_10 : f32 to vector<32x128xf32>
      %c0_11 = arith.constant 0 : index
      %c0_12 = arith.constant 0 : index
      %13 = vector.load %arg7[%c0_11, %c0_12] : memref<32x128xf32, #tpu.memory_space<vmem>>, vector<32x128xf32>
      tpu.vector_store %arg7[%c0_11, %c0_12], %12 {strides = array<i32>} : memref<32x128xf32, #tpu.memory_space<vmem>>, vector<32x128xf32>,
    } else {
    }
    %c0 = arith.constant 0 : index
    %c0_1 = arith.constant 0 : index
    %3 = vector.load %arg7[%c0, %c0_1] : memref<32x128xf32, #tpu.memory_space<vmem>>, vector<32x128xf32>
    %c0_2 = arith.constant 0 : index
    %c0_3 = arith.constant 0 : index
    %4 = vector.load %arg2[%c0_2, %c0_3] : memref<32x32xf32, #tpu.memory_space<vmem>>, vector<32x32xf32>
    %c0_4 = arith.constant 0 : index
    %c0_5 = arith.constant 0 : index
    %5 = vector.load %arg3[%c0_4, %c0_5] : memref<32x128xf32, #tpu.memory_space<vmem>>, vector<32x128xf32>
    %cst = arith.constant dense<0.000000e+00> : vector<32x128xf32>
    %6 = tpu.matmul %4, %5, %cst {dimension_numbers = #tpu.dot_dimension_numbers<[1], [0], [0], [1], [0, 0, 1, 1], [], []>} : vector<32x32xf32>, vector<32x128xf32>, vector<32x128xf32> -> vector<32x128xf32>
    %7 = arith.addf %3, %6 : vector<32x128xf32>
    %c0_6 = arith.constant 0 : index
    %c0_7 = arith.constant 0 : index
    %8 = vector.load %arg7[%c0_6, %c0_7] : memref<32x128xf32, #tpu.memory_space<vmem>>, vector<32x128xf32>
    tpu.vector_store %arg7[%c0_6, %c0_7], %7 {strides = array<i32>} : memref<32x128xf32, #tpu.memory_space<vmem>>, vector<32x128xf32>,
    %c0_i32_8 = arith.constant 0 : i32
    %9 = arith.cmpi eq, %arg1, %c0_i32_8 : i32
    %10 = arith.extui %9 : i1 to i32
    %c0_i32_9 = arith.constant 0 : i32
    %11 = arith.cmpi ne, %10, %c0_i32_9 : i32
    scf.if %11 {
      %c0_10 = arith.constant 0 : index
      %c0_11 = arith.constant 0 : index
      %12 = vector.load %arg7[%c0_10, %c0_11] : memref<32x128xf32, #tpu.memory_space<vmem>>, vector<32x128xf32>
      %c0_12 = arith.constant 0 : index
      %c0_13 = arith.constant 0 : index
      %13 = vector.load %arg4[%c0_12, %c0_13] : memref<1x128xf32, #tpu.memory_space<vmem>>, vector<1x128xf32>
      %14 = vector.broadcast %13 : vector<1x128xf32> to vector<32x128xf32>
      %15 = arith.addf %12, %14 : vector<32x128xf32>
      %cst_14 = arith.constant 0.000000e+00 : f32
      %16 = vector.broadcast %cst_14 : f32 to vector<32x128xf32>
      %17 = arith.maximumf %15, %16 : vector<32x128xf32>
      %c0_15 = arith.constant 0 : index
      %c0_16 = arith.constant 0 : index
      %18 = vector.load %arg5[%c0_15, %c0_16] : memref<128x128xf32, #tpu.memory_space<vmem>>, vector<128x128xf32>
      %cst_17 = arith.constant dense<0.000000e+00> : vector<32x128xf32>
      %19 = tpu.matmul %17, %18, %cst_17 {dimension_numbers = #tpu.dot_dimension_numbers<[1], [0], [0], [1], [0, 0, 1, 1], [], []>} : vector<32x128xf32>, vector<128x128xf32>, vector<32x128xf32> -> vector<32x128xf32>
      %c0_18 = arith.constant 0 : index
      %c0_19 = arith.constant 0 : index
      %20 = vector.load %arg6[%c0_18, %c0_19] : memref<32x128xf32, #tpu.memory_space<vmem>>, vector<32x128xf32>
      tpu.vector_store %arg6[%c0_18, %c0_19], %19 {strides = array<i32>} : memref<32x128xf32, #tpu.memory_space<vmem>>, vector<32x128xf32>,
    } else {
    }
    return
  }
  func.func @transform_0(%arg0: i32, %arg1: i32) -> (i32, i32) {
    %c0_i32 = arith.constant 0 : i32
    return %arg0, %arg1 : i32, i32
  }
  func.func @transform_1(%arg0: i32, %arg1: i32) -> (i32, i32) {
    %c0_i32 = arith.constant 0 : i32
    %c0_i32_0 = arith.constant 0 : i32
    return %arg1, %c0_i32 : i32, i32
  }
  func.func @transform_2(%arg0: i32, %arg1: i32) -> (i32, i32) {
    %c0_i32 = arith.constant 0 : i32
    %c0_i32_0 = arith.constant 0 : i32
    %c0_i32_1 = arith.constant 0 : i32
    return %c0_i32, %c0_i32_0 : i32, i32
  }
  func.func @transform_3(%arg0: i32, %arg1: i32) -> (i32, i32) {
    %c0_i32 = arith.constant 0 : i32
    %c0_i32_0 = arith.constant 0 : i32
    %c0_i32_1 = arith.constant 0 : i32
    return %c0_i32, %c0_i32_0 : i32, i32
  }
  func.func @transform_4(%arg0: i32, %arg1: i32) -> (i32, i32) {
    %c0_i32 = arith.constant 0 : i32
    %c0_i32_0 = arith.constant 0 : i32
    return %arg0, %c0_i32 : i32, i32
  }
}

module attributes {stable_mosaic.version = 11 : i64} {
  func.func @_layer2_softmax_kernel(%arg0: i32, %arg1: i32, %arg2: memref<32x32xf32, #tpu.memory_space<vmem>>, %arg3: memref<32x128xf32, #tpu.memory_space<vmem>>, %arg4: memref<1x128xf32, #tpu.memory_space<vmem>>, %arg5: memref<32x128xf32, #tpu.memory_space<vmem>>, %arg6: memref<32x128xf32, #tpu.memory_space<vmem>>) attributes {dimension_semantics = [#tpu.dimension_semantics<parallel>, #tpu.dimension_semantics<arbitrary>], iteration_bounds = array<i64: 1, 1>, scalar_prefetch = 0 : i64, scratch_operands = 1 : i64, tpu.core_type = #tpu.core_type<tc>, window_params = [{transform_indices = @transform_0, window_bounds = array<i64: 32, 32>}, {transform_indices = @transform_1, window_bounds = array<i64: 32, 128>}, {pipeline_mode = #tpu.pipeline_mode<synchronous>, transform_indices = @transform_2, window_bounds = array<i64: 1, 128>}, {transform_indices = @transform_3, window_bounds = array<i64: 32, 128>}]} {
    %c0_i32 = arith.constant 0 : i32
    %0 = arith.cmpi eq, %arg1, %c0_i32 : i32
    %1 = arith.extui %0 : i1 to i32
    %c0_i32_0 = arith.constant 0 : i32
    %2 = arith.cmpi ne, %1, %c0_i32_0 : i32
    scf.if %2 {
      %cst_10 = arith.constant 0.000000e+00 : f32
      %12 = vector.broadcast %cst_10 : f32 to vector<32x128xf32>
      %c0_11 = arith.constant 0 : index
      %c0_12 = arith.constant 0 : index
      %13 = vector.load %arg6[%c0_11, %c0_12] : memref<32x128xf32, #tpu.memory_space<vmem>>, vector<32x128xf32>
      tpu.vector_store %arg6[%c0_11, %c0_12], %12 {strides = array<i32>} : memref<32x128xf32, #tpu.memory_space<vmem>>, vector<32x128xf32>,
    } else {
    }
    %c0 = arith.constant 0 : index
    %c0_1 = arith.constant 0 : index
    %3 = vector.load %arg6[%c0, %c0_1] : memref<32x128xf32, #tpu.memory_space<vmem>>, vector<32x128xf32>
    %c0_2 = arith.constant 0 : index
    %c0_3 = arith.constant 0 : index
    %4 = vector.load %arg2[%c0_2, %c0_3] : memref<32x32xf32, #tpu.memory_space<vmem>>, vector<32x32xf32>
    %c0_4 = arith.constant 0 : index
    %c0_5 = arith.constant 0 : index
    %5 = vector.load %arg3[%c0_4, %c0_5] : memref<32x128xf32, #tpu.memory_space<vmem>>, vector<32x128xf32>
    %cst = arith.constant dense<0.000000e+00> : vector<32x128xf32>
    %6 = tpu.matmul %4, %5, %cst {dimension_numbers = #tpu.dot_dimension_numbers<[1], [0], [0], [1], [0, 0, 1, 1], [], []>} : vector<32x32xf32>, vector<32x128xf32>, vector<32x128xf32> -> vector<32x128xf32>
    %7 = arith.addf %3, %6 : vector<32x128xf32>
    %c0_6 = arith.constant 0 : index
    %c0_7 = arith.constant 0 : index
    %8 = vector.load %arg6[%c0_6, %c0_7] : memref<32x128xf32, #tpu.memory_space<vmem>>, vector<32x128xf32>
    tpu.vector_store %arg6[%c0_6, %c0_7], %7 {strides = array<i32>} : memref<32x128xf32, #tpu.memory_space<vmem>>, vector<32x128xf32>,
    %c0_i32_8 = arith.constant 0 : i32
    %9 = arith.cmpi eq, %arg1, %c0_i32_8 : i32
    %10 = arith.extui %9 : i1 to i32
    %c0_i32_9 = arith.constant 0 : i32
    %11 = arith.cmpi ne, %10, %c0_i32_9 : i32
    scf.if %11 {
      %c0_10 = arith.constant 0 : index
      %c0_11 = arith.constant 0 : index
      %12 = vector.load %arg6[%c0_10, %c0_11] : memref<32x128xf32, #tpu.memory_space<vmem>>, vector<32x128xf32>
      %c0_12 = arith.constant 0 : index
      %c0_13 = arith.constant 0 : index
      %13 = vector.load %arg4[%c0_12, %c0_13] : memref<1x128xf32, #tpu.memory_space<vmem>>, vector<1x128xf32>
      %14 = vector.broadcast %13 : vector<1x128xf32> to vector<32x128xf32>
      %15 = arith.addf %12, %14 : vector<32x128xf32>
      %cst_14 = arith.constant dense<0xFF800000> : vector<32xf32>
      %16 = vector.multi_reduction <maximumf>, %15, %cst_14 [1] : vector<32x128xf32> to vector<32xf32>
      %17 = vector.shape_cast %16 : vector<32xf32> to vector<32x1xf32>
      %18 = vector.broadcast %17 : vector<32x1xf32> to vector<32x128xf32>
      %19 = arith.subf %15, %18 : vector<32x128xf32>
      %20 = math.exp %19 : vector<32x128xf32>
      %cst_15 = arith.constant dense<0.000000e+00> : vector<32xf32>
      %21 = vector.multi_reduction <add>, %20, %cst_15 [1] : vector<32x128xf32> to vector<32xf32>
      %22 = vector.shape_cast %21 : vector<32xf32> to vector<32x1xf32>
      %23 = tpu.reciprocal %22 {approx = true} : vector<32x1xf32> -> vector<32x1xf32>
      %24 = vector.broadcast %23 : vector<32x1xf32> to vector<32x128xf32>
      %25 = arith.mulf %20, %24 : vector<32x128xf32>
      %c0_16 = arith.constant 0 : index
      %c0_17 = arith.constant 0 : index
      %26 = vector.load %arg5[%c0_16, %c0_17] : memref<32x128xf32, #tpu.memory_space<vmem>>, vector<32x128xf32>
      tpu.vector_store %arg5[%c0_16, %c0_17], %25 {strides = array<i32>} : memref<32x128xf32, #tpu.memory_space<vmem>>, vector<32x128xf32>,
    } else {
    }
    return
  }
  func.func @transform_0(%arg0: i32, %arg1: i32) -> (i32, i32) {
    %c0_i32 = arith.constant 0 : i32
    return %arg0, %arg1 : i32, i32
  }
  func.func @transform_1(%arg0: i32, %arg1: i32) -> (i32, i32) {
    %c0_i32 = arith.constant 0 : i32
    %c0_i32_0 = arith.constant 0 : i32
    return %arg1, %c0_i32 : i32, i32
  }
  func.func @transform_2(%arg0: i32, %arg1: i32) -> (i32, i32) {
    %c0_i32 = arith.constant 0 : i32
    %c0_i32_0 = arith.constant 0 : i32
    %c0_i32_1 = arith.constant 0 : i32
    return %c0_i32, %c0_i32_0 : i32, i32
  }
  func.func @transform_3(%arg0: i32, %arg1: i32) -> (i32, i32) {
    %c0_i32 = arith.constant 0 : i32
    %c0_i32_0 = arith.constant 0 : i32
    return %arg0, %c0_i32 : i32, i32
  }
}

</mosaic_0001>

<bundles_post_ra>
// kernel: gcn_forward.3
= control target key start
LH: loop header
LB: loop body
LE: loop exit
PB: predicated region body
PF: predicated region fallthrough
CT: control target
= control target key end

     0   :  { %s317_s1 = inlined_call_operand.vmem [shape: f32[128,128], index: 1, kind: input, shape index: {}]   ;;  %s318_s0 = inlined_call_operand.vmem [shape: f32[32,128], index: 0, kind: input, shape index: {}]   ;;  %s319_s2 = inlined_call_operand.vmem [shape: f32[32,128], index: 2, kind: output, shape index: {}]  }
   0x1   :  { %v15_v0 = vld [vmem:[%s317_s1] sm:$0xff]  ;;  %v16_v1 = vld [vmem:[%s317_s1 + $0x8] sm:$0xff]  ;;  %v17_v2 = vld [vmem:[%s317_s1 + $0x10] sm:$0xff] }
   0x2   :  { %v182_v3 = vpack.c.bf16 %v16_v1, %v15_v0  ;;  %v18_v4 = vld [vmem:[%s317_s1 + $0x18] sm:$0xff]  ;;  %v19_v6 = vld [vmem:[%s317_s1 + $0x20] sm:$0xff]  ;;  %v20_v7 = vld [vmem:[%s317_s1 + $0x28] sm:$0xff] }
   0x3   :  { %v186_v5 = vpack.c.bf16 %v18_v4, %v17_v2  ;;  %v190_v8 = vpack.c.bf16 %v20_v7, %v19_v6  ;;  %v11_v9 = vld [vmem:[%s318_s0] sm:$0xff]  ;;  %v13_v10 = vld [vmem:[%s318_s0 + $0x10] sm:$0xff]  ;;  %v22_v12 = vld [vmem:[%s317_s1 + $0x38] sm:$0xff] }
   0x4   :  { %183 = vmatprep.subr.bf16.mxu0 %v182_v3  ;;  %214 = vmatprep.subr.bf16.mxu1 %v182_v3  ;;  %v21_v11 = vld [vmem:[%s317_s1 + $0x30] sm:$0xff]  ;;  %v23_v14 = vld [vmem:[%s317_s1 + $0x40] sm:$0xff]  ;;  %v24_v15 = vld [vmem:[%s317_s1 + $0x48] sm:$0xff] }
   0x5   :  { %185 = vmatpush3.bf16.msra.mxu0 %v182_v3  ;;  %222 = vmatpush3.bf16.msra.mxu1 %v182_v3  ;;  %v194_v13 = vpack.c.bf16 %v22_v12, %v21_v11  ;;  %v198_v16 = vpack.c.bf16 %v24_v15, %v23_v14  ;;  %v25_v17 = vld [vmem:[%s317_s1 + $0x50] sm:$0xff]  ;;  %v26_v18 = vld [vmem:[%s317_s1 + $0x58] sm:$0xff]  ;;  %v27_v20 = vld [vmem:[%s317_s1 + $0x60] sm:$0xff] }
   0x6   :  { %187 = vmatprep.subr.bf16.mxu0 %v186_v5  ;;  %215 = vmatprep.subr.bf16.mxu1 %v186_v5  ;;  %v202_v19 = vpack.c.bf16 %v26_v18, %v25_v17  ;;  %v28_v21 = vld [vmem:[%s317_s1 + $0x68] sm:$0xff]  ;;  %v29_v23 = vld [vmem:[%s317_s1 + $0x70] sm:$0xff]  ;;  %v30_v24 = vld [vmem:[%s317_s1 + $0x78] sm:$0xff] }
   0x7   :  { %176 = vmatprep.mubr.f32.mxu0 %v11_v9  ;;  %179 = vmatprep.mubr.f32.mxu1 %v13_v10  ;;  %v206_v22 = vpack.c.bf16 %v28_v21, %v27_v20  ;;  %v210_v25 = vpack.c.bf16 %v30_v24, %v29_v23  ;;  %v12_v26 = vld [vmem:[%s318_s0 + $0x8] sm:$0xff]  ;;  %v14_v27 = vld [vmem:[%s318_s0 + $0x18] sm:$0xff] }
   0x9   :  { %189 = vmatpush3.bf16.msra.mxu0 %v186_v5  ;;  %223 = vmatpush3.bf16.msra.mxu1 %v186_v5 }
   0xa   :  { %191 = vmatprep.subr.bf16.mxu0 %v190_v8  ;;  %216 = vmatprep.subr.bf16.mxu1 %v190_v8 }
   0xd   :  { %193 = vmatpush3.bf16.msra.mxu0 %v190_v8  ;;  %224 = vmatpush3.bf16.msra.mxu1 %v190_v8 }
   0xe   :  { %195 = vmatprep.subr.bf16.mxu0 %v194_v13  ;;  %217 = vmatprep.subr.bf16.mxu1 %v194_v13 }
  0x11   :  { %197 = vmatpush3.bf16.msra.mxu0 %v194_v13  ;;  %225 = vmatpush3.bf16.msra.mxu1 %v194_v13 }
  0x12   :  { %199 = vmatprep.subr.bf16.mxu0 %v198_v16  ;;  %218 = vmatprep.subr.bf16.mxu1 %v198_v16 }
  0x15   :  { %201 = vmatpush3.bf16.msra.mxu0 %v198_v16  ;;  %226 = vmatpush3.bf16.msra.mxu1 %v198_v16 }
  0x16   :  { %203 = vmatprep.subr.bf16.mxu0 %v202_v19  ;;  %219 = vmatprep.subr.bf16.mxu1 %v202_v19 }
  0x19   :  { %205 = vmatpush3.bf16.msra.mxu0 %v202_v19  ;;  %227 = vmatpush3.bf16.msra.mxu1 %v202_v19 }
  0x1a   :  { %207 = vmatprep.subr.bf16.mxu0 %v206_v22  ;;  %220 = vmatprep.subr.bf16.mxu1 %v206_v22 }
  0x1d   :  { %209 = vmatpush3.bf16.msra.mxu0 %v206_v22  ;;  %228 = vmatpush3.bf16.msra.mxu1 %v206_v22 }
  0x1e   :  { %211 = vmatprep.subr.bf16.mxu0 %v210_v25  ;;  %221 = vmatprep.subr.bf16.mxu1 %v210_v25 }
  0x21   :  { %213 = vmatpush3.bf16.msra.mxu0 %v210_v25  ;;  %229 = vmatpush3.bf16.msra.mxu1 %v210_v25 }
  0x24   :  { %177 = vmatmul.mubr.f32.vlgmr.msra.gmra.mrb[0].mxu0 %v12_v26  ;;  %180 = vmatmul.mubr.f32.vlgmr.msra.gmra.mrb[0].mxu1 %v14_v27 }
  0xf7   :  { %v178_v28 = vpop.f32.mrb[0].mxu0  ;;  %v181_v29 = vpop.f32.mrb[0].mxu1 }
  0xf8   :  { %117 = vst [vmem:[%s319_s2 + $0x8] sm:$0xff] %v178_v28  ;;  %119 = vst [vmem:[%s319_s2 + $0x18] sm:$0xff] %v181_v29  ;;  %v97_v30 = vpop.f32.mrb[1].mxu0  ;;  %v107_v31 = vpop.f32.mrb[1].mxu1 }
  0xf9   :  { %116 = vst [vmem:[%s319_s2] sm:$0xff] %v97_v30  ;;  %118 = vst [vmem:[%s319_s2 + $0x10] sm:$0xff] %v107_v31 }

// kernel: gcn_forward.4
= control target key start
LH: loop header
LB: loop body
LE: loop exit
PB: predicated region body
PF: predicated region fallthrough
CT: control target
= control target key end

     0   :  { %vm37_vm0 = vcmask 261120   ;;  %s515_s1 = inlined_call_operand.vmem [shape: f32[32,128], index: 1, kind: input, shape index: {}]   ;;  %s516_s0 = inlined_call_operand.vmem [shape: f32[32,32], index: 0, kind: input, shape index: {}]   ;;  %s517_s3 = inlined_call_operand.vmem [shape: f32[128,128], index: 3, kind: input, shape index: {}]   ;;  %s518_s2 = inlined_call_operand.vmem [shape: f32[1,128], index: 2, kind: input, shape index: {}]   ;;  %s519_s4 = inlined_call_operand.vmem [shape: f32[32,128], index: 4, kind: output, shape index: {}]  }
   0x1   :  { %v33_v0 = vld [vmem:[%s515_s1] sm:$0xff]  ;;  %v34_v1 = vld [vmem:[%s515_s1 + $0x8] sm:$0xff]  ;;  %v35_v2 = vld [vmem:[%s515_s1 + $0x10] sm:$0xff] }
   0x2   :  { %v359_v3 = vpack.c.bf16 %v34_v1, %v33_v0  ;;  %v36_v4 = vld [vmem:[%s515_s1 + $0x18] sm:$0xff]  ;;  %v29_v5 = vld [vmem:[%s516_s0] sm:$0xff]  ;;  %v166_v8 = vld [vmem:[%s517_s3 + $0x8] sm:$0xff] }
   0x3   :  { %v363_v6 = vpack.c.bf16 %v36_v4, %v35_v2  ;;  %315 = vmatprep.mubr.msk.f32.mxu0 %vm37_vm0, %v29_v5  ;;  %v165_v7 = vld [vmem:[%s517_s3] sm:$0xff]  ;;  %v167_v9 = vld [vmem:[%s517_s3 + $0x10] sm:$0xff]  ;;  %v168_v10 = vld [vmem:[%s517_s3 + $0x18] sm:$0xff] }
   0x4   :  { %360 = vmatprep.subr.bf16.mxu0 %v359_v3  ;;  %v367_v11 = vpack.c.bf16 %v166_v8, %v165_v7  ;;  %v371_v12 = vpack.c.bf16 %v168_v10, %v167_v9  ;;  %v169_v13 = vld [vmem:[%s517_s3 + $0x20] sm:$0xff]  ;;  %v170_v14 = vld [vmem:[%s517_s3 + $0x28] sm:$0xff]  ;;  %v31_v17 = vld [vmem:[%s516_s0 + $0x10] sm:$0xff] }
   0x5   :  { %362 = vmatpush3.bf16.msra.mxu0 %v359_v3  ;;  %v30_v15 = vld [vmem:[%s516_s0 + $0x8] sm:$0xff]  ;;  %v375_v16 = vpack.c.bf16 %v170_v14, %v169_v13  ;;  %v171_v18 = vld [vmem:[%s517_s3 + $0x30] sm:$0xff]  ;;  %v172_v19 = vld [vmem:[%s517_s3 + $0x38] sm:$0xff] }
   0x6   :  { %364 = vmatprep.subr.bf16.mxu0 %v363_v6  ;;  %368 = vmatprep.subr.bf16.mxu1 %v367_v11  ;;  %v32_v20 = vld [vmem:[%s516_s0 + $0x18] sm:$0xff]  ;;  %v379_v21 = vpack.c.bf16 %v172_v19, %v171_v18  ;;  %v173_v22 = vld [vmem:[%s517_s3 + $0x40] sm:$0xff]  ;;  %v174_v23 = vld [vmem:[%s517_s3 + $0x48] sm:$0xff] }
   0x7   :  { %370 = vmatpush3.bf16.msra.mxu1 %v367_v11  ;;  %v383_v24 = vpack.c.bf16 %v174_v23, %v173_v22  ;;  %v175_v25 = vld [vmem:[%s517_s3 + $0x50] sm:$0xff]  ;;  %v176_v26 = vld [vmem:[%s517_s3 + $0x58] sm:$0xff]  ;;  %v177_v28 = vld [vmem:[%s517_s3 + $0x60] sm:$0xff] }
   0x8   :  { %372 = vmatprep.subr.bf16.mxu1 %v371_v12  ;;  %v387_v27 = vpack.c.bf16 %v176_v26, %v175_v25  ;;  %v178_v29 = vld [vmem:[%s517_s3 + $0x68] sm:$0xff]  ;;  %v179_v31 = vld [vmem:[%s517_s3 + $0x70] sm:$0xff]  ;;  %v180_v32 = vld [vmem:[%s517_s3 + $0x78] sm:$0xff] }
   0x9   :  { %366 = vmatpush3.bf16.msra.mxu0 %v363_v6  ;;  %v391_v30 = vpack.c.bf16 %v178_v29, %v177_v28  ;;  %v395_v33 = vpack.c.bf16 %v180_v32, %v179_v31  ;;  %v278_v34 = vld [vmem:[%s518_s2] ss:$0 sm:$0xff] }
   0xb   :  { %374 = vmatpush3.bf16.msra.mxu1 %v371_v12 }
   0xc   :  { %316 = vmatmul.mubr.msk.f32.vlgmr.msra.gmra.mrb[0].mxu0 %vm37_vm0, %v30_v15  ;;  %376 = vmatprep.subr.bf16.mxu1 %v375_v16 }
   0xd   :  { %318 = vmatprep.mubr.msk.f32.mxu0 %vm37_vm0, %v31_v17 }
   0xf   :  { %378 = vmatpush3.bf16.msra.mxu1 %v375_v16 }
  0x10   :  { %319 = vmatmul.mubr.msk.f32.gmra.mrb[2].mxu0 %vm37_vm0, %v32_v20  ;;  %380 = vmatprep.subr.bf16.mxu1 %v379_v21 }
  0x13   :  { %382 = vmatpush3.bf16.msra.mxu1 %v379_v21 }
  0x14   :  { %384 = vmatprep.subr.bf16.mxu1 %v383_v24 }
  0x17   :  { %386 = vmatpush3.bf16.msra.mxu1 %v383_v24 }
  0x18   :  { %388 = vmatprep.subr.bf16.mxu1 %v387_v27 }
  0x1b   :  { %390 = vmatpush3.bf16.msra.mxu1 %v387_v27 }
  0x1c   :  { %392 = vmatprep.subr.bf16.mxu1 %v391_v30 }
  0x1f   :  { %394 = vmatpush3.bf16.msra.mxu1 %v391_v30 }
  0x20   :  { %396 = vmatprep.subr.bf16.mxu1 %v395_v33 }
  0x23   :  { %398 = vmatpush3.bf16.msra.mxu1 %v395_v33 }
  0xdf   :  { %v317_v35 = vpop.f32.mrb[0].mxu0 }
  0xe0   :  { %v158_v36 = vadd.f32 %v317_v35, %v278_v34  ;;  %v116_v37 = vpop.f32.mrb[1].mxu0 }
  0xe1   :  { %v157_v38 = vadd.f32 %v278_v34, %v116_v37 }
  0xe2   :  { %v162_v41 = vmax.f32 %v158_v36, 0.0 }
  0xe3   :  { %v320_v39 = vpop.f32.mrb[2].mxu0  ;;  %v161_v40 = vmax.f32 %v157_v38, 0.0 }
  0xe4   :  { %v160_v42 = vadd.f32 %v320_v39, %v278_v34  ;;  %v126_v43 = vpop.f32.mrb[3].mxu0 }
  0xe5   :  { %v159_v44 = vadd.f32 %v278_v34, %v126_v43  ;;  %353 = vmatprep.mubr.f32.mxu1 %v161_v40 }
  0xe6   :  { %354 = vmatmul.mubr.f32.vlgmr.msra.gmra.mrb[0].mxu1 %v162_v41  ;;  %v164_v46 = vmax.f32 %v160_v42, 0.0 }
  0xe7   :  { %v163_v45 = vmax.f32 %v159_v44, 0.0 }
  0xe9   :  { %356 = vmatprep.mubr.f32.mxu1 %v163_v45 }
  0xea   :  { %357 = vmatmul.mubr.f32.gmra.mrb[2].mxu1 %v164_v46 }
 0x1b9   :  { %v355_v47 = vpop.f32.mrb[0].mxu1 }
 0x1ba   :  { %267 = vst [vmem:[%s519_s4 + $0x8] sm:$0xff] %v355_v47  ;;  %v247_v48 = vpop.f32.mrb[1].mxu1 }
 0x1bb   :  { %266 = vst [vmem:[%s519_s4] sm:$0xff] %v247_v48 }
 0x1bd   :  { %v358_v49 = vpop.f32.mrb[2].mxu1 }
 0x1be   :  { %269 = vst [vmem:[%s519_s4 + $0x18] sm:$0xff] %v358_v49  ;;  %v257_v50 = vpop.f32.mrb[3].mxu1 }
 0x1bf   :  { %268 = vst [vmem:[%s519_s4 + $0x10] sm:$0xff] %v257_v50 }

// kernel: gcn_forward.5
= control target key start
LH: loop header
LB: loop body
LE: loop exit
PB: predicated region body
PF: predicated region fallthrough
CT: control target
= control target key end

     0   :  { %vm34_vm0 = vcmask 261120   ;;  %s320_s1 = inlined_call_operand.vmem [shape: f32[32,128], index: 1, kind: input, shape index: {}]   ;;  %s321_s0 = inlined_call_operand.vmem [shape: f32[32,32], index: 0, kind: input, shape index: {}]   ;;  %s322_s2 = inlined_call_operand.vmem [shape: f32[1,128], index: 2, kind: input, shape index: {}]   ;;  %s323_s3 = inlined_call_operand.vmem [shape: f32[32,128], index: 3, kind: output, shape index: {}]  }
   0x1   :  { %v30_v0 = vld [vmem:[%s320_s1] sm:$0xff]  ;;  %v31_v1 = vld [vmem:[%s320_s1 + $0x8] sm:$0xff]  ;;  %v32_v2 = vld [vmem:[%s320_s1 + $0x10] sm:$0xff] }
   0x2   :  { %v229_v3 = vpack.c.bf16 %v31_v1, %v30_v0  ;;  %v33_v4 = vld [vmem:[%s320_s1 + $0x18] sm:$0xff]  ;;  %v26_v5 = vld [vmem:[%s321_s0] sm:$0xff]  ;;  %v28_v6 = vld [vmem:[%s321_s0 + $0x10] sm:$0xff] }
   0x3   :  { %v233_v7 = vpack.c.bf16 %v33_v4, %v32_v2  ;;  %223 = vmatprep.mubr.msk.f32.mxu0 %vm34_vm0, %v26_v5  ;;  %226 = vmatprep.mubr.msk.f32.mxu1 %vm34_vm0, %v28_v6  ;;  %v27_v8 = vld [vmem:[%s321_s0 + $0x8] sm:$0xff]  ;;  %v29_v9 = vld [vmem:[%s321_s0 + $0x18] sm:$0xff]  ;;  %v206_v10 = vld [vmem:[%s322_s2] ss:$0 sm:$0xff] }
   0x4   :  { %230 = vmatprep.subr.bf16.mxu0 %v229_v3  ;;  %237 = vmatprep.subr.bf16.mxu1 %v229_v3 }
   0x5   :  { %232 = vmatpush3.bf16.msra.mxu0 %v229_v3  ;;  %239 = vmatpush3.bf16.msra.mxu1 %v229_v3 }
   0x6   :  { %234 = vmatprep.subr.bf16.mxu0 %v233_v7  ;;  %238 = vmatprep.subr.bf16.mxu1 %v233_v7 }
   0x9   :  { %236 = vmatpush3.bf16.msra.mxu0 %v233_v7  ;;  %240 = vmatpush3.bf16.msra.mxu1 %v233_v7 }
   0xc   :  { %224 = vmatmul.mubr.msk.f32.vlgmr.msra.gmra.mrb[0].mxu0 %vm34_vm0, %v27_v8  ;;  %227 = vmatmul.mubr.msk.f32.vlgmr.msra.gmra.mrb[0].mxu1 %vm34_vm0, %v29_v9 }
  0xdf   :  { %v225_v11 = vpop.f32.mrb[0].mxu0  ;;  %v228_v12 = vpop.f32.mrb[0].mxu1 }
  0xe0   :  { %v113_v13 = vpop.f32.mrb[1].mxu0  ;;  %v123_v14 = vpop.f32.mrb[1].mxu1  ;;  %v157_v17 = vadd.f32 %v228_v12, %v206_v10  ;;  %v155_v18 = vadd.f32 %v225_v11, %v206_v10 }
  0xe1   :  { %v154_v15 = vadd.f32 %v206_v10, %v113_v13  ;;  %v156_v16 = vadd.f32 %v206_v10, %v123_v14 }
  0xe3   :  { %162 = vmax.xlane.f32.xlu1 %v156_v16  ;;  %158 = vmax.xlane.f32.xlu0 %v154_v15 }
  0xe7   :  { %164 = vmax.xlane.f32.xlu1 %v157_v17  ;;  %160 = vmax.xlane.f32.xlu0 %v155_v18 }
 0x170   :  { %v163_v19 = vpop.xlane.xlu1 %162  ;;  %v159_v20 = vpop.xlane.xlu0 %158 }
 0x171   :  { %v168_v21 = vsub.f32 %v156_v16, %v163_v19  ;;  %v166_v22 = vsub.f32 %v154_v15, %v159_v20 }
 0x173   :  { %v170_v23 = vmul.f32 1.442695, %v166_v22  ;;  %v174_v26 = vmul.f32 1.442695, %v168_v21 }
 0x174   :  { %v165_v24 = vpop.xlane.xlu1 %164  ;;  %v161_v25 = vpop.xlane.xlu0 %160 }
 0x175   :  { %v167_v27 = vsub.f32 %v155_v18, %v161_v25  ;;  %241 = vpow2.f32 %v170_v23  ;;  %v169_v28 = vsub.f32 %v157_v17, %v165_v24 }
 0x176   :  { %243 = vpow2.f32 %v174_v26 }
 0x177   :  { %v172_v29 = vmul.f32 1.442695, %v167_v27  ;;  %v176_v30 = vmul.f32 1.442695, %v169_v28 }
 0x179   :  { %245 = vpow2.f32 %v172_v29 }
 0x17a   :  { %247 = vpow2.f32 %v176_v30 }
 0x17f   :  { %v242_v31 = vpop.eup %241 }
 0x180   :  { %178 = vadd.xlane.f32.xlu0 %v242_v31  ;;  %v244_v32 = vpop.eup %243 }
 0x183   :  { %v246_v33 = vpop.eup %245 }
 0x184   :  { %182 = vadd.xlane.f32.xlu0 %v244_v32  ;;  %180 = vadd.xlane.f32.xlu1 %v246_v33  ;;  %v248_v34 = vpop.eup %247 }
 0x188   :  { %184 = vadd.xlane.f32.xlu1 %v248_v34 }
 0x20d   :  { %v179_v35 = vpop.xlane.xlu0 %178 }
 0x20e   :  { %249 = vrcp.f32 %v179_v35 }
 0x211   :  { %v181_v36 = vpop.xlane.xlu1 %180  ;;  %v183_v37 = vpop.xlane.xlu0 %182 }
 0x212   :  { %251 = vrcp.f32 %v181_v36 }
 0x213   :  { %253 = vrcp.f32 %v183_v37 }
 0x215   :  { %v185_v38 = vpop.xlane.xlu1 %184 }
 0x216   :  { %255 = vrcp.f32 %v185_v38 }
 0x218   :  { %v250_v39 = vpop.eup %249 }
 0x219   :  { %v190_v40 = vmul.f32 %v250_v39, %v242_v31 }
 0x21b   :  { %194 = vst [vmem:[%s323_s3] sm:$0xff] %v190_v40 }
 0x21c   :  { %v252_v41 = vpop.eup %251 }
 0x21d   :  { %v254_v42 = vpop.eup %253  ;;  %v191_v43 = vmul.f32 %v252_v41, %v246_v33 }
 0x21e   :  { %v192_v44 = vmul.f32 %v254_v42, %v244_v32 }
 0x21f   :  { %195 = vst [vmem:[%s323_s3 + $0x8] sm:$0xff] %v191_v43 }
 0x220   :  { %v256_v45 = vpop.eup %255  ;;  %196 = vst [vmem:[%s323_s3 + $0x10] sm:$0xff] %v192_v44 }
 0x221   :  { %v193_v46 = vmul.f32 %v256_v45, %v248_v34 }
 0x223   :  { %197 = vst [vmem:[%s323_s3 + $0x18] sm:$0xff] %v193_v46 }

</bundles_post_ra>
